<compile_context>
chip_gen: v7x
topology: tpu7x:2x2x1
jax: 0.10.0
libtpu: 0.0.40
codegen_flags: <defaults>
</compile_context>

<pallas_src>
import jax
import jax.numpy as jnp
from jax.experimental import pallas as pl
from jax.experimental.pallas import tpu as pltpu

FEAT = 64                    # self.feat
GAP_DAY = 5                  # dilation
KSIZE = 360 // GAP_DAY       # 72, conv kernel size
HID = FEAT * 4               # 256, MLP hidden width


def _round_up(v, m):
    return ((v + m - 1) // m) * m


def _choose_nt(n, nt_max, min_steps=4):
    """Largest 128-multiple lane tile <= nt_max that still yields >= min_steps
    grid steps (>= 2 per v7x TensorCore) so the patches DMA can double-buffer."""
    n128 = _round_up(n, 128)
    if n128 <= 128 * min_steps:
        return 128
    return min(nt_max, _round_up(-(-n // min_steps), 128))


def _fused_mlp_kernel(p_ref, wf_ref, bf_ref, w2_ref, b2_ref, out_ref):
    # p_ref:   (KSIZE, Nt) bf16   im2col patches; column n = flat (batch, time)
    # wf_ref:  (HID, KSIZE) bf16  fused (mlp_in @ conv) weight
    # bf_ref:  (HID, 1)  f32      fused bias  (mlp_in @ conv_b + b1)
    # w2_ref:  (HID, 1)  f32      mlp['out'].weight as a column
    # b2_ref:  (1,) SMEM f32      mlp['out'].bias (scalar)
    # out_ref: (1, Nt)   f32

    # Conv1d(1,64,k=72,d=5) + Linear(64->256) fused into ONE full-height MXU
    # matmul: bf16 operands, f32 accumulation.
    h1 = jnp.dot(wf_ref[...], p_ref[...],
                 preferred_element_type=jnp.float32) + bf_ref[...]    # (HID, Nt)
    h1 = jnp.maximum(h1, 0.0)                                         # ReLU

    # Linear(256 -> 1) on the VPU (broadcast-mul + sublane reduce) + Sigmoid;
    # keeps the MXU free and overlaps with the matmul drain.
    o = jnp.sum(h1 * w2_ref[...], axis=0, keepdims=True) + b2_ref[0]  # (1, Nt)
    out_ref[...] = jax.nn.sigmoid(o)


def model_d_dilate_forward(x, params, *, nt_max=2048):
    """x: (B, 1, L) float32 -> (B, 1, L_out) float32, matching PyTorch NCL."""
    conv_w, conv_b, w1, b1, w2, b2 = params
    B, c_in, L = x.shape
    assert c_in == 1
    l_out = L - GAP_DAY * (KSIZE - 1)
    assert l_out > 0

    hi = jax.lax.Precision.HIGHEST
    # Fuse Conv1d into the first Linear (both are linear maps; exact algebra,
    # done once in f32 in the wrapper).
    w_fused = jnp.dot(w1, conv_w[:, 0, :], precision=hi)              # (HID, K)
    b_fused = (jnp.dot(w1, conv_b, precision=hi) + b1)[:, None]       # (HID, 1)

    # im2col on HBM: patches[k, b*l_out + t] = x[b, t + k*dilation].
    # Cast to bf16 to halve HBM traffic into the kernel.
    # TODO(synk): for very long L on bandwidth-bound v5e, build the patch block
    # in-kernel from the raw signal instead of this 72x-expanded HBM array.
    x2d = x[:, 0, :]                                                  # (B, L)
    patches = jnp.stack(
        [x2d[:, k * GAP_DAY:k * GAP_DAY + l_out] for k in range(KSIZE)],
        axis=0,
    ).reshape(KSIZE, B * l_out).astype(jnp.bfloat16)                  # (K, N)

    n = B * l_out
    nt = _choose_nt(n, nt_max)                                        # lane tile
    n_pad = _round_up(n, nt)
    if n_pad != n:                                                    # pad so nt | N
        patches = jnp.pad(patches, ((0, 0), (0, n_pad - n)))

    wf_bf = w_fused.astype(jnp.bfloat16)                              # (HID, K)
    w2col = w2.reshape(HID)[:, None].astype(jnp.float32)              # (HID, 1)
    b2s = b2.reshape((1,)).astype(jnp.float32)                        # (1,) -> SMEM

    cost = pl.CostEstimate(
        flops=2 * HID * KSIZE * n_pad + 3 * HID * n_pad,
        transcendentals=n_pad,
        bytes_accessed=(patches.size * 2 + wf_bf.size * 2
                        + (2 * HID + n_pad) * 4),
    )

    out_flat = pl.pallas_call(
        _fused_mlp_kernel,
        out_shape=jax.ShapeDtypeStruct((1, n_pad), jnp.float32),
        grid=(n_pad // nt,),
        in_specs=[
            pl.BlockSpec((KSIZE, nt), lambda i: (0, i)),        # patches tile
            pl.BlockSpec((HID, KSIZE), lambda i: (0, 0)),       # fused weight (resident)
            pl.BlockSpec((HID, 1), lambda i: (0, 0)),           # fused bias
            pl.BlockSpec((HID, 1), lambda i: (0, 0)),           # mlp out weight (column)
            pl.BlockSpec(memory_space=pltpu.MemorySpace.SMEM),  # mlp out bias (scalar)
        ],
        out_specs=pl.BlockSpec((1, nt), lambda i: (0, i)),
        compiler_params=pltpu.CompilerParams(
            dimension_semantics=("parallel",)),
        cost_estimate=cost,
    )(patches, wf_bf, b_fused, w2col, b2s)

    # Columns are ordered b*l_out + t, so this reshape is a free view.
    return out_flat[0, :n].reshape(B, 1, l_out)


def init_params(key):
    """Deterministic PyTorch-default-style (uniform +/- 1/sqrt(fan_in)) init."""
    ks = jax.random.split(key, 6)
    b_conv = 1.0 / (1 * KSIZE) ** 0.5
    conv_w = jax.random.uniform(ks[0], (FEAT, 1, KSIZE), jnp.float32, -b_conv, b_conv)
    conv_b = jax.random.uniform(ks[1], (FEAT,), jnp.float32, -b_conv, b_conv)
    b_in = 1.0 / FEAT ** 0.5
    w1 = jax.random.uniform(ks[2], (HID, FEAT), jnp.float32, -b_in, b_in)
    b1 = jax.random.uniform(ks[3], (HID,), jnp.float32, -b_in, b_in)
    b_out = 1.0 / HID ** 0.5
    w2 = jax.random.uniform(ks[4], (1, HID), jnp.float32, -b_out, b_out)
    b2 = jax.random.uniform(ks[5], (1,), jnp.float32, -b_out, b_out)
    return conv_w, conv_b, w1, b1, w2, b2


def ref_forward(x, params):
    """Pure-JAX reference of the PyTorch forward pass (f32, HIGHEST precision)."""
    conv_w, conv_b, w1, b1, w2, b2 = params
    B, _, L = x.shape
    l_out = L - GAP_DAY * (KSIZE - 1)
    idx = jnp.arange(l_out)[:, None] + jnp.arange(KSIZE)[None, :] * GAP_DAY
    xc = x[:, 0, :][:, idx]                                            # (B, l_out, K)
    h = jnp.einsum("blk,fk->blf", xc, conv_w[:, 0, :],
                   precision=jax.lax.Precision.HIGHEST) + conv_b       # (B, l_out, F)
    h1 = jnp.maximum(
        jnp.einsum("blf,gf->blg", h, w1,
                   precision=jax.lax.Precision.HIGHEST) + b1, 0.0)     # (B, l_out, HID)
    o = jnp.einsum("blg,og->blo", h1, w2,
                   precision=jax.lax.Precision.HIGHEST) + b2           # (B, l_out, 1)
    return jax.nn.sigmoid(o).transpose(0, 2, 1)                        # (B, 1, l_out)


if __name__ == "__main__":
    key = jax.random.PRNGKey(0)
    k_param, k_x = jax.random.split(key)
    params = init_params(k_param)

    # L chosen so l_out = L - dilation*(KSIZE-1) = 483 - 355 = 128 (lane-dense);
    # B=8 -> N = 1024 -> nt = 256 -> 4 "parallel" grid steps (>= 2 per v7x
    # TensorCore, keeping the patches DMA double-buffered behind compute).
    B, L = 8, 483
    x = jax.random.normal(k_x, (B, 1, L), dtype=jnp.float32)

    out = jax.jit(model_d_dilate_forward)(x, params)
    out = jax.block_until_ready(out)

    ref = ref_forward(x, params)
    assert out.shape == (B, 1, L - GAP_DAY * (KSIZE - 1))
    err = float(jnp.max(jnp.abs(out - ref)))
    # bf16 MXU operands with f32 accumulation through a sigmoid: abs error is
    # well under 3e-3 at these magnitudes.
    assert err < 3e-3, err

    print("KERNEL_OK")
</pallas_src>

<mosaic_0001>
module attributes {stable_mosaic.version = 11 : i64} {
  func.func @_fused_mlp_kernel(%arg0: i32, %arg1: memref<72x256xbf16, #tpu.memory_space<vmem>>, %arg2: memref<256x72xbf16, #tpu.memory_space<vmem>>, %arg3: memref<256x1xf32, #tpu.memory_space<vmem>>, %arg4: memref<256x1xf32, #tpu.memory_space<vmem>>, %arg5: memref<1xf32, #tpu.memory_space<smem>>, %arg6: memref<1x256xf32, #tpu.memory_space<vmem>>) attributes {dimension_semantics = [#tpu.dimension_semantics<parallel>], iteration_bounds = array<i64: 4>, scalar_prefetch = 0 : i64, scratch_operands = 0 : i64, tpu.core_type = #tpu.core_type<tc>, window_params = [{transform_indices = @transform_0, window_bounds = array<i64: 72, 256>}, {pipeline_mode = #tpu.pipeline_mode<synchronous>, transform_indices = @transform_1, window_bounds = array<i64: 256, 72>}, {pipeline_mode = #tpu.pipeline_mode<synchronous>, transform_indices = @transform_2, window_bounds = array<i64: 256, 1>}, {pipeline_mode = #tpu.pipeline_mode<synchronous>, transform_indices = @transform_3, window_bounds = array<i64: 256, 1>}, {transform_indices = @transform_4, window_bounds = array<i64: 1>}, {transform_indices = @transform_5, window_bounds = array<i64: 1, 256>}]} {
    %c0 = arith.constant 0 : index
    %c0_0 = arith.constant 0 : index
    %0 = vector.load %arg2[%c0, %c0_0] : memref<256x72xbf16, #tpu.memory_space<vmem>>, vector<256x72xbf16>
    %c0_1 = arith.constant 0 : index
    %c0_2 = arith.constant 0 : index
    %1 = vector.load %arg1[%c0_1, %c0_2] : memref<72x256xbf16, #tpu.memory_space<vmem>>, vector<72x256xbf16>
    %cst = arith.constant dense<0.000000e+00> : vector<256x256xf32>
    %2 = tpu.matmul %0, %1, %cst {dimension_numbers = #tpu.dot_dimension_numbers<[1], [0], [0], [1], [0, 0, 1, 1], [], []>} : vector<256x72xbf16>, vector<72x256xbf16>, vector<256x256xf32> -> vector<256x256xf32>
    %c0_3 = arith.constant 0 : index
    %c0_4 = arith.constant 0 : index
    %3 = vector.load %arg3[%c0_3, %c0_4] : memref<256x1xf32, #tpu.memory_space<vmem>>, vector<256x1xf32>
    %4 = vector.broadcast %3 : vector<256x1xf32> to vector<256x256xf32>
    %5 = arith.addf %2, %4 : vector<256x256xf32>
    %cst_5 = arith.constant 0.000000e+00 : f32
    %6 = vector.broadcast %cst_5 : f32 to vector<256x256xf32>
    %7 = arith.maximumf %5, %6 : vector<256x256xf32>
    %c0_6 = arith.constant 0 : index
    %c0_7 = arith.constant 0 : index
    %8 = vector.load %arg4[%c0_6, %c0_7] : memref<256x1xf32, #tpu.memory_space<vmem>>, vector<256x1xf32>
    %9 = vector.broadcast %8 : vector<256x1xf32> to vector<256x256xf32>
    %10 = arith.mulf %7, %9 : vector<256x256xf32>
    %cst_8 = arith.constant dense<0.000000e+00> : vector<256xf32>
    %11 = vector.multi_reduction <add>, %10, %cst_8 [0] : vector<256x256xf32> to vector<256xf32>
    %12 = vector.shape_cast %11 : vector<256xf32> to vector<1x256xf32>
    %c0_9 = arith.constant 0 : index
    %13 = memref.load %arg5[%c0_9] : memref<1xf32, #tpu.memory_space<smem>>
    %14 = vector.broadcast %13 : f32 to vector<1x256xf32>
    %15 = arith.addf %12, %14 : vector<1x256xf32>
    %16 = arith.negf %15 : vector<1x256xf32>
    %17 = math.exp %16 : vector<1x256xf32>
    %cst_10 = arith.constant 1.000000e+00 : f32
    %18 = vector.broadcast %cst_10 : f32 to vector<1x256xf32>
    %19 = arith.addf %18, %17 : vector<1x256xf32>
    %20 = arith.divf %18, %19 : vector<1x256xf32>
    %c0_11 = arith.constant 0 : index
    %c0_12 = arith.constant 0 : index
    %21 = vector.load %arg6[%c0_11, %c0_12] : memref<1x256xf32, #tpu.memory_space<vmem>>, vector<1x256xf32>
    tpu.vector_store %arg6[%c0_11, %c0_12], %20 {strides = array<i32>} : memref<1x256xf32, #tpu.memory_space<vmem>>, vector<1x256xf32>,
    return
  }
  func.func @transform_0(%arg0: i32) -> (i32, i32) {
    %c0_i32 = arith.constant 0 : i32
    %c0_i32_0 = arith.constant 0 : i32
    return %c0_i32, %arg0 : i32, i32
  }
  func.func @transform_1(%arg0: i32) -> (i32, i32) {
    %c0_i32 = arith.constant 0 : i32
    %c0_i32_0 = arith.constant 0 : i32
    %c0_i32_1 = arith.constant 0 : i32
    return %c0_i32, %c0_i32_0 : i32, i32
  }
  func.func @transform_2(%arg0: i32) -> (i32, i32) {
    %c0_i32 = arith.constant 0 : i32
    %c0_i32_0 = arith.constant 0 : i32
    %c0_i32_1 = arith.constant 0 : i32
    return %c0_i32, %c0_i32_0 : i32, i32
  }
  func.func @transform_3(%arg0: i32) -> (i32, i32) {
    %c0_i32 = arith.constant 0 : i32
    %c0_i32_0 = arith.constant 0 : i32
    %c0_i32_1 = arith.constant 0 : i32
    return %c0_i32, %c0_i32_0 : i32, i32
  }
  func.func @transform_4(%arg0: i32) -> i32 {
    %c0_i32 = arith.constant 0 : i32
    %c0_i32_0 = arith.constant 0 : i32
    return %c0_i32 : i32
  }
  func.func @transform_5(%arg0: i32) -> (i32, i32) {
    %c0_i32 = arith.constant 0 : i32
    %c0_i32_0 = arith.constant 0 : i32
    return %c0_i32, %arg0 : i32, i32
  }
}

</mosaic_0001>

<bundles_post_ra>
// kernel: model_d_dilate_forward.1
= control target key start
LH: loop header
LB: loop body
LE: loop exit
PB: predicated region body
PF: predicated region fallthrough
CT: control target
= control target key end

     0   :  { %s2358_s0 = inlined_call_operand.vmem [shape: bf16[72,1024], index: 0, kind: input, shape index: {}]   ;;  %s2359_s1 = inlined_call_operand.vmem [shape: bf16[256,72], index: 1, kind: input, shape index: {}]   ;;  %s2360_s2 = inlined_call_operand.vmem [shape: f32[256,1], index: 2, kind: input, shape index: {}]   ;;  %s2361_s3 = inlined_call_operand.vmem [shape: f32[256,1], index: 3, kind: input, shape index: {}]   ;;  %s2362_s4 = inlined_call_operand.<no memory space> [shape: f32[1], index: 4, kind: input, shape index: {}]   ;;  %s2363_s5 = inlined_call_operand.hbm [shape: f32[1,1024], index: 5, kind: output, shape index: {}]  }
   0x1   :  { %10 = sst [smem:[#allocation2]] %s2362_s4 }
   0x2   :  { %11 = vsyncpa [#allocation5], 0 }
   0x3   :  { %13 = vsyncpa [#allocation5 + $0x1], 0  ;;  %s1666_s20 = smov 0   ;;  %s1668_s21 = smov 0  }
   0x4   :  { %s1670_s22 = smov 0   ;;  %s1672_s23 = smov 0  }
   0x5 LB: > { %s1413_s4 = sadd.s32 4294967295, %s1628_s23   ;;  %s1414_s24 = sadd.s32 4294967294, %s1628_s23   ;;  %s1628_s23 = sphi %s1672_s23, %s2389_s23   ;;  %s1624_s22 = sphi %s1670_s22, %s2388_s22   ;;  %s1620_s21 = sphi %s1668_s21, %s2387_s21   ;;  %s1616_s20 = sphi %s1666_s20, %s2386_s20  }
   0x6   : > { %s1689_s25 = sadd.s32 1, %s1628_s23   ;;  %s26_s26 = sadd.s32 1, %s1624_s22 }
   0x7   : > { %s23_s27 = ssub.s32 %s1628_s23, %s1689_s25  ;;  %p33_p0 = scmp.ne.s32.totalorder %s1624_s22, %s1620_s21 }
   0x8   : > { %p24_p1 = scmp.eq.s32.totalorder %s23_s27, 0  ;;  %p34_p2 = scmp.eq.s32.totalorder %s1628_s23, 0 }
   0x9   : > { %p147_p3 = scmp.eq.s32.totalorder %s1413_s4, 3  ;;  %p152_p4 = scmp.ne.s32.totalorder %s1620_s21, %s1616_s20 }
   0xa   : > { %s1702_s28 = scalar_select %p24_p1, %s1624_s22, %s26_s26  }
   0xb   : > { %p35_p5 = por %p34_p2, %p33_p0  ;;  %p1704_p6 = por %p147_p3, %p33_p0 }
   0xc   : > { %p153_p7 = scmp.eq.s32.totalorder %s1414_s24, 3  ;;  %p1416_p9 = scmp.ge.s32.totalorder %s1628_s23, 4 }
   0xe   : > { %p1708_p8 = por %p153_p7, %p152_p4  ;;  %181 = sbr.rel (%p1416_p9) target bundleno = 34 (0x22), region = 32 }
  0x15   : > { %184 = sbr.rel (!%p35_p5) target bundleno = 34 (0x22), region = 36  ;;  %s186_s6 = sand.u32 (%p35_p5), 1, %s1624_s22  }
  0x16   : > { %s1471_s7 = sshll.u32 (%p35_p5), %s1628_s23, 3  ;;  %s1483_s8 = smul.u32 (%p35_p5), 72, %s186_s6 }
  0x17   : > { %s191_s11 = scalar_lea.vmem (%p35_p5), %s2358_s0, %s1471_s7 }
  0x18   : > { %v235_v0 = vld [vmem:[%s191_s11] sm:$0xff] (%p35_p5)  ;;  %s188_s12 = scalar_lea.vmem (%p35_p5), [#allocation3], %s1483_s8 }
  0x19   : > { %v237_v1 = vld [vmem:[%s191_s11 + $0x20] sm:$0xff] (%p35_p5)  ;;  %236 = vst [vmem:[%s188_s12] sm:$0xff] (%p35_p5), %v235_v0 }
  0x1a   : > { %v239_v2 = vld [vmem:[%s191_s11 + $0x40] sm:$0xff] (%p35_p5)  ;;  %238 = vst [vmem:[%s188_s12 + $0x8] sm:$0xff] (%p35_p5), %v237_v1 }
  0x1b   : > { %v241_v3 = vld [vmem:[%s191_s11 + $0x60] sm:$0xff] (%p35_p5)  ;;  %240 = vst [vmem:[%s188_s12 + $0x10] sm:$0xff] (%p35_p5), %v239_v2 }
  0x1c   : > { %v243_v4 = vld [vmem:[%s191_s11 + $0x80] sm:$0xff]  ;;  %242 = vst [vmem:[%s188_s12 + $0x18] sm:$0xff] %v241_v3 }
  0x1d   : > { %v245_v5 = vld [vmem:[%s191_s11 + $0xa0] sm:$0xff]  ;;  %244 = vst [vmem:[%s188_s12 + $0x20] sm:$0xff] %v243_v4 }
  0x1e   : > { %246 = vst [vmem:[%s188_s12 + $0x28] sm:$0xff] %v245_v5  ;;  %v247_v6 = vld [vmem:[%s191_s11 + $0xc0] sm:$0xff] }
  0x1f   : > { %v249_v7 = vld [vmem:[%s191_s11 + $0xe0] sm:$0xff]  ;;  %248 = vst [vmem:[%s188_s12 + $0x30] sm:$0xff] %v247_v6 }
  0x20   : > { %v251_v8 = vld [vmem:[%s191_s11 + $0x100] sm:$0xff]  ;;  %250 = vst [vmem:[%s188_s12 + $0x38] sm:$0xff] %v249_v7 }
  0x21   : > { %252 = vst [vmem:[%s188_s12 + $0x40] sm:$0xff] %v251_v8 }
  0x22 PF: > { %p1419_p10 = scmp.ge.s32.totalorder %s1628_s23, 1  ;;  %p257_p11 = scmp.lt.s32.totalorder %s1628_s23, 5 }
  0x24   : > { %p258_p12 = pnand %p1419_p10, %p257_p11 }
  0x26   : > { %261 = sbr.rel (%p258_p12) target bundleno = 443 (0x1bb), region = 74 }
  0x2d   : > { %v337_v9 = vld [vmem:[%s2360_s2 + $0x10] sm:$0xff]  ;;  %v335_v10 = vld [vmem:[%s2360_s2] sm:$0xff]  ;;  %s1727_s17 = sand.u32 1, %s1620_s21   ;;  %v1630_v11 = vmov 0   ;;  %v338_v12 = vld [vmem:[%s2360_s2 + $0x18] sm:$0xff]  ;;  %vm701_vm0 = vcmask 1043456  }
  0x2e   : > { %1527 = vset.pattern.permute.xlu1 %v1630_v11  ;;  %1526 = vset.pattern.permute.xlu0 %v1630_v11  ;;  %s1484_s18 = smul.u32 72, %s1727_s17  ;;  %v336_v13 = vld [vmem:[%s2360_s2 + $0x8] sm:$0xff]  ;;  %v339_v18 = vld [vmem:[%s2360_s2 + $0x20] sm:$0xff]  ;;  %v342_v21 = vld [vmem:[%s2360_s2 + $0x38] sm:$0xff]  ;;  %vm652_vm1 = vcmask 588800   ;;  %s1295_s15 = sld [smem:[#allocation2]] }
  0x2f   : > { %379 = vperm.xlu1 %1527, %v337_v9   ;;  %369 = vperm.xlu0 %1526, %v335_v10   ;;  %v340_v17 = vld [vmem:[%s2360_s2 + $0x28] sm:$0xff]  ;;  %v341_v22 = vld [vmem:[%s2360_s2 + $0x30] sm:$0xff]  ;;  %v343_v27 = vld [vmem:[%s2360_s2 + $0x40] sm:$0xff]  ;;  %s1420_s16 = sshll.u32 %s1727_s17, 1 }
  0x30   : > { %740 = vmatprep.mubr.bf16.mxu0 %v1630_v11  ;;  %820 = vmatprep.mubr.bf16.mxu1 %v1630_v11  ;;  %s1740_s6 = scalar_lea.vmem [#allocation3], %s1484_s18  ;;  %v344_v26 = vld [vmem:[%s2360_s2 + $0x48] sm:$0xff]  ;;  %v346_v31 = vld [vmem:[%s2360_s2 + $0x58] sm:$0xff]  ;;  %v345_v32 = vld [vmem:[%s2360_s2 + $0x50] sm:$0xff]  ;;  %s1472_s18 = sshll.u32 %s1413_s4, 5 }
  0x31   : > { %v1528_v14 = vld [vmem:[%s1740_s6 + $0x4] ss:$8 sps:$4 sm:$0xff]   ;;  %v1530_v15 = vld [vmem:[%s1740_s6] ss:$8 sps:$4 sm:$0xff]   ;;  %v1531_v16 = vld [vmem:[%s1740_s6 + $0x14] ss:$8 sps:$4 sm:$0xff]   ;;  %s2315_s7 = scalar_lea.hbm %s2363_s5, %s1472_s18 }
  0x32   : > { %708 = vmatprep.subr.bf16.mxu0 %v1528_v14  ;;  %1473 = vmatprep.subr.bf16.mxu1 %v1528_v14  ;;  %v1533_v19 = vld [vmem:[%s1740_s6 + $0x10] ss:$8 sps:$4 sm:$0xff]   ;;  %v1534_v20 = vld [vmem:[%s1740_s6 + $0x24] ss:$8 sps:$4 sm:$0xff]   ;;  %v1536_v23 = vld [vmem:[%s1740_s6 + $0x20] ss:$8 sps:$4 sm:$0xff]  }
  0x33   : > { %384 = vperm.xlu1 %1527, %v338_v12   ;;  %374 = vperm.xlu0 %1526, %v336_v13   ;;  %v1537_v24 = vld [vmem:[%s1740_s6 + $0x34] ss:$8 sps:$4 sm:$0xff]   ;;  %v334_v25 = vld [vmem:[%s1740_s6 + $0x40] sm:$0xff]  ;;  %v1539_v28 = vld [vmem:[%s1740_s6 + $0x30] ss:$8 sps:$4 sm:$0xff]   ;;  %s290_s19 = scalar_lea.vmem [#allocation4], %s1420_s16 }
  0x34   : > { %709 = vmatpush1.bf16.msra.mxu0 %v1530_v15  ;;  %1478 = vmatpush1.bf16.msra.mxu1 %v1530_v15  ;;  %v1446_v29 = vcombine.high %v334_v25, %v334_v25  ;;  %v1445_v30 = vcombine.low %v334_v25, %v334_v25  ;;  %v348_v34 = vld [vmem:[%s2360_s2 + $0x68] sm:$0xff]  ;;  %v347_v35 = vld [vmem:[%s2360_s2 + $0x60] sm:$0xff]  ;;  %v350_v38 = vld [vmem:[%s2360_s2 + $0x78] sm:$0xff]  ;;  %s1349_s24 = sshll.u32 %s290_s19, 4  ;;  %s1335_s6 = scalar_lea.sflag [#allocation5], %s1727_s17  ;;  %s2317_s24 = int_to_ptr.vmem [resolvable:$true] %s1349_s24 }
  0x35   : > { %710 = vmatprep.subr.bf16.mxu0 %v1531_v16  ;;  %1474 = vmatprep.subr.bf16.mxu1 %v1531_v16  ;;  %v1542_v36 = vld [vmem:[%s2359_s1] sm:$0xff]   ;;  %v349_v39 = vld [vmem:[%s2360_s2 + $0x70] sm:$0xff]  ;;  %v352_v40 = vld [vmem:[%s2360_s2 + $0x88] sm:$0xff]  ;;  %s1566_s8 = scalar_lea.vmem %s2317_s24, 32  ;;  %s1632_s4 = smov [#allocation4]  }
  0x36   : > { %v703_v33 = vsel %vm701_vm0, %v1445_v30, 0  ;;  %v1543_v37 = vld [vmem:[%s2359_s1 + $0x40] sm:$0xff]   ;;  %v1544_v42 = vld [vmem:[%s2359_s1 + $0x8] sm:$0xff]   ;;  %v354_v44 = vld [vmem:[%s2360_s2 + $0x98] sm:$0xff]  ;;  %p1567_p13 = scmp.ne.s32.totalorder %s2317_s24, %s1566_s8  ;;  %s1570_s9 = sshll.u32 %s1632_s4, 4  ;;  %s1571_s9 = int_to_ptr.vmem [resolvable:$false] %s1570_s9 }
  0x37   : > { %394 = vperm.xlu1 %1527, %v340_v17   ;;  %389 = vperm.xlu0 %1526, %v339_v18   ;;  %v351_v41 = vld [vmem:[%s2360_s2 + $0x80] sm:$0xff]  ;;  %v1545_v43 = vld [vmem:[%s2359_s1 + $0x48] sm:$0xff]   ;;  %v353_v45 = vld [vmem:[%s2360_s2 + $0x90] sm:$0xff]  ;;  %s1572_s10 = scalar_lea.vmem %s1571_s9, 64  ;;  %p1573_p2 = scmp.lt.s32.totalorder %s2317_s24, %s1571_s9 }
  0x38   : > { %711 = vmatpush1.bf16.msra.mxu0 %v1533_v19  ;;  %1479 = vmatpush1.bf16.msra.mxu1 %v1533_v19  ;;  %v966_v46 = vld [vmem:[%s2361_s3 + $0x8] sm:$0xff]  ;;  %v965_v47 = vld [vmem:[%s2361_s3] sm:$0xff]  ;;  %v1546_v48 = vld [vmem:[%s2359_s1 + $0x10] sm:$0xff]   ;;  %p1568_p0 = pnand %p1567_p13, %p1704_p6  ;;  %p1574_p3 = scmp.lt.s32.totalorder %s1572_s10, %s1566_s8 }
  0x39   : > { %712 = vmatprep.subr.bf16.mxu0 %v1534_v20  ;;  %1475 = vmatprep.subr.bf16.mxu1 %v1534_v20  ;;  %v1547_v49 = vld [vmem:[%s2359_s1 + $0x50] sm:$0xff]   ;;  %v968_v50 = vld [vmem:[%s2361_s3 + $0x18] sm:$0xff]  ;;  %v970_v52 = vld [vmem:[%s2361_s3 + $0x28] sm:$0xff] }
  0x3a   : > { %v967_v51 = vld [vmem:[%s2361_s3 + $0x10] sm:$0xff]  ;;  %v969_v53 = vld [vmem:[%s2361_s3 + $0x20] sm:$0xff]  ;;  %v1548_v54 = vld [vmem:[%s2359_s1 + $0x18] sm:$0xff]   ;;  %p1569_p1 = pneg %p1568_p0  ;;  %p1575_p4 = por %p1574_p3, %p1573_p2 }
  0x3b   : > { %404 = vperm.xlu1 %1527, %v342_v21   ;;  %399 = vperm.xlu0 %1526, %v341_v22   ;;  %v1549_v55 = vld [vmem:[%s2359_s1 + $0x58] sm:$0xff]   ;;  %v971_v57 = vld [vmem:[%s2361_s3 + $0x30] sm:$0xff]  ;;  %v974_v58 = vld [vmem:[%s2361_s3 + $0x48] sm:$0xff] }
  0x3c   : > { %713 = vmatpush1.bf16.msra.mxu0 %v1536_v23  ;;  %1480 = vmatpush1.bf16.msra.mxu1 %v1536_v23  ;;  %v972_v56 = vld [vmem:[%s2361_s3 + $0x38] sm:$0xff]  ;;  %v973_v59 = vld [vmem:[%s2361_s3 + $0x40] sm:$0xff]  ;;  %v975_v63 = vld [vmem:[%s2361_s3 + $0x50] sm:$0xff]  ;;  %p1576_p5 = pnand %p1575_p4, %p1569_p1 }
  0x3d   : > { %714 = vmatprep.subr.bf16.mxu0 %v1537_v24  ;;  %1476 = vmatprep.subr.bf16.mxu1 %v1537_v24  ;;  %v1550_v60 = vld [vmem:[%s2359_s1 + $0x20] sm:$0xff]   ;;  %v976_v62 = vld [vmem:[%s2361_s3 + $0x58] sm:$0xff]  ;;  %v978_v0 = vld [vmem:[%s2361_s3 + $0x68] sm:$0xff] }
  0x3e   : > { %v1551_v61 = vld [vmem:[%s2359_s1 + $0x60] sm:$0xff]   ;;  %v1552_v2 = vld [vmem:[%s2359_s1 + $0x28] sm:$0xff]   ;;  %v980_v4 = vld [vmem:[%s2361_s3 + $0x78] sm:$0xff] }
  0x3f   : > { %414 = vperm.xlu1 %1527, %v344_v26   ;;  %409 = vperm.xlu0 %1526, %v343_v27   ;;  %v977_v1 = vld [vmem:[%s2361_s3 + $0x60] sm:$0xff]  ;;  %v1553_v3 = vld [vmem:[%s2359_s1 + $0x68] sm:$0xff]   ;;  %v979_v5 = vld [vmem:[%s2361_s3 + $0x70] sm:$0xff] }
  0x40   : > { %715 = vmatpush1.bf16.msra.mxu0 %v1539_v28  ;;  %1481 = vmatpush1.bf16.msra.mxu1 %v1539_v28  ;;  %v982_v6 = vld [vmem:[%s2361_s3 + $0x88] sm:$0xff]  ;;  %v981_v7 = vld [vmem:[%s2361_s3 + $0x80] sm:$0xff]  ;;  %v1554_v8 = vld [vmem:[%s2359_s1 + $0x30] sm:$0xff]  }
  0x41   : > { %1447 = vmatprep.subr.msk.bf16.mxu0 %vm701_vm0, %v1446_v29  ;;  %1477 = vmatprep.subr.msk.bf16.mxu1 %vm701_vm0, %v1446_v29  ;;  %v1555_v9 = vld [vmem:[%s2359_s1 + $0x70] sm:$0xff]   ;;  %v355_v12 = vld [vmem:[%s2360_s2 + $0xa0] sm:$0xff]  ;;  %v984_v13 = vld [vmem:[%s2361_s3 + $0x98] sm:$0xff] }
  0x42   : > { %v983_v10 = vld [vmem:[%s2361_s3 + $0x90] sm:$0xff]  ;;  %v356_v14 = vld [vmem:[%s2360_s2 + $0xa8] sm:$0xff]  ;;  %v1556_v15 = vld [vmem:[%s2359_s1 + $0x38] sm:$0xff]  }
  0x43   : > { %424 = vperm.xlu1 %1527, %v346_v31   ;;  %419 = vperm.xlu0 %1526, %v345_v32   ;;  %v1557_v16 = vld [vmem:[%s2359_s1 + $0x78] sm:$0xff]   ;;  %v357_v17 = vld [vmem:[%s2360_s2 + $0xb0] sm:$0xff]  ;;  %v986_v18 = vld [vmem:[%s2361_s3 + $0xa8] sm:$0xff] }
  0x44   : > { %717 = vmatpush1.bf16.msra.mxu0 %v703_v33  ;;  %1482 = vmatpush1.bf16.msra.mxu1 %v703_v33  ;;  %v358_v19 = vld [vmem:[%s2360_s2 + $0xb8] sm:$0xff]  ;;  %v987_v20 = vld [vmem:[%s2361_s3 + $0xb0] sm:$0xff]  ;;  %v359_v21 = vld [vmem:[%s2360_s2 + $0xc0] sm:$0xff] }
  0x45   : > { %v988_v22 = vld [vmem:[%s2361_s3 + $0xb8] sm:$0xff]  ;;  %v360_v23 = vld [vmem:[%s2360_s2 + $0xc8] sm:$0xff]  ;;  %v989_v24 = vld [vmem:[%s2361_s3 + $0xc0] sm:$0xff] }
  0x46   : > { %v361_v25 = vld [vmem:[%s2360_s2 + $0xd0] sm:$0xff]  ;;  %v990_v26 = vld [vmem:[%s2361_s3 + $0xc8] sm:$0xff]  ;;  %v362_v27 = vld [vmem:[%s2360_s2 + $0xd8] sm:$0xff] }
  0x47   : > { %434 = vperm.xlu1 %1527, %v348_v34   ;;  %429 = vperm.xlu0 %1526, %v347_v35   ;;  %v991_v28 = vld [vmem:[%s2361_s3 + $0xd0] sm:$0xff]  ;;  %v363_v29 = vld [vmem:[%s2360_s2 + $0xe0] sm:$0xff]  ;;  %v992_v30 = vld [vmem:[%s2361_s3 + $0xd8] sm:$0xff] }
  0x48   : > { %1448 = vmatmul.mubr.msk.bf16.vlgmr.msra.gmra.mrb[0].mxu0 %vm652_vm1, %v1542_v36  ;;  %1456 = vmatmul.mubr.msk.bf16.vlgmr.msra.gmra.mrb[0].mxu1 %vm652_vm1, %v1543_v37  ;;  %v364_v31 = vld [vmem:[%s2360_s2 + $0xe8] sm:$0xff]  ;;  %v993_v32 = vld [vmem:[%s2361_s3 + $0xe0] sm:$0xff]  ;;  %v365_v33 = vld [vmem:[%s2360_s2 + $0xf0] sm:$0xff] }
  0x49   : > { %750 = vmatprep.mubr.bf16.mxu0 %v1630_v11  ;;  %830 = vmatprep.mubr.bf16.mxu1 %v1630_v11  ;;  %v994_v34 = vld [vmem:[%s2361_s3 + $0xe8] sm:$0xff]  ;;  %v366_v35 = vld [vmem:[%s2360_s2 + $0xf8] sm:$0xff]  ;;  %v995_v37 = vld [vmem:[%s2361_s3 + $0xf0] sm:$0xff] }
  0x4a   : > { %v996_v36 = vld [vmem:[%s2361_s3 + $0xf8] sm:$0xff] }
  0x4b   : > { %444 = vperm.xlu1 %1527, %v350_v38   ;;  %439 = vperm.xlu0 %1526, %v349_v39  }
  0x4f   : > { %454 = vperm.xlu1 %1527, %v352_v40   ;;  %449 = vperm.xlu0 %1526, %v351_v41  }
  0x50   : > { %1449 = vmatmul.mubr.msk.bf16.gmra.mrb[4].mxu0 %vm652_vm1, %v1544_v42  ;;  %1457 = vmatmul.mubr.msk.bf16.gmra.mrb[4].mxu1 %vm652_vm1, %v1545_v43 }
  0x51   : > { %760 = vmatprep.mubr.bf16.mxu0 %v1630_v11  ;;  %840 = vmatprep.mubr.bf16.mxu1 %v1630_v11 }
  0x53   : > { %464 = vperm.xlu1 %1527, %v354_v44   ;;  %459 = vperm.xlu0 %1526, %v353_v45  }
  0x57   : > { %1004 = vperm.xlu1 %1527, %v966_v46   ;;  %999 = vperm.xlu0 %1526, %v965_v47  }
  0x58   : > { %1450 = vmatmul.mubr.msk.bf16.gmra.mrb[8].mxu0 %vm652_vm1, %v1546_v48  ;;  %1458 = vmatmul.mubr.msk.bf16.gmra.mrb[8].mxu1 %vm652_vm1, %v1547_v49 }
  0x59   : > { %770 = vmatprep.mubr.bf16.mxu0 %v1630_v11  ;;  %850 = vmatprep.mubr.bf16.mxu1 %v1630_v11 }
  0x5b   : > { %1014 = vperm.xlu1 %1527, %v968_v50   ;;  %1009 = vperm.xlu0 %1526, %v967_v51  }
  0x5f   : > { %1024 = vperm.xlu1 %1527, %v970_v52   ;;  %1019 = vperm.xlu0 %1526, %v969_v53  }
  0x60   : > { %1451 = vmatmul.mubr.msk.bf16.gmra.mrb[12].mxu0 %vm652_vm1, %v1548_v54  ;;  %1459 = vmatmul.mubr.msk.bf16.gmra.mrb[12].mxu1 %vm652_vm1, %v1549_v55 }
  0x61   : > { %780 = vmatprep.mubr.bf16.mxu0 %v1630_v11  ;;  %860 = vmatprep.mubr.bf16.mxu1 %v1630_v11 }
  0x63   : > { %1034 = vperm.xlu1 %1527, %v972_v56   ;;  %1029 = vperm.xlu0 %1526, %v971_v57  }
  0x67   : > { %1044 = vperm.xlu1 %1527, %v974_v58   ;;  %1039 = vperm.xlu0 %1526, %v973_v59  }
  0x68   : > { %1452 = vmatmul.mubr.msk.bf16.gmra.mrb[16].mxu0 %vm652_vm1, %v1550_v60  ;;  %1460 = vmatmul.mubr.msk.bf16.gmra.mrb[16].mxu1 %vm652_vm1, %v1551_v61 }
  0x69   : > { %790 = vmatprep.mubr.bf16.mxu0 %v1630_v11  ;;  %870 = vmatprep.mubr.bf16.mxu1 %v1630_v11 }
  0x6b   : > { %1054 = vperm.xlu1 %1527, %v976_v62   ;;  %1049 = vperm.xlu0 %1526, %v975_v63  }
  0x6f   : > { %1064 = vperm.xlu1 %1527, %v978_v0   ;;  %1059 = vperm.xlu0 %1526, %v977_v1  }
  0x70   : > { %1453 = vmatmul.mubr.msk.bf16.gmra.mrb[20].mxu0 %vm652_vm1, %v1552_v2  ;;  %1461 = vmatmul.mubr.msk.bf16.gmra.mrb[20].mxu1 %vm652_vm1, %v1553_v3 }
  0x71   : > { %800 = vmatprep.mubr.bf16.mxu0 %v1630_v11  ;;  %880 = vmatprep.mubr.bf16.mxu1 %v1630_v11 }
  0x73   : > { %1074 = vperm.xlu1 %1527, %v980_v4   ;;  %1069 = vperm.xlu0 %1526, %v979_v5  }
  0x77   : > { %1084 = vperm.xlu1 %1527, %v982_v6   ;;  %1079 = vperm.xlu0 %1526, %v981_v7  }
  0x78   : > { %1454 = vmatmul.mubr.msk.bf16.gmra.mrb[24].mxu0 %vm652_vm1, %v1554_v8  ;;  %1462 = vmatmul.mubr.msk.bf16.gmra.mrb[24].mxu1 %vm652_vm1, %v1555_v9 }
  0x79   : > { %810 = vmatprep.mubr.bf16.mxu0 %v1630_v11  ;;  %890 = vmatprep.mubr.bf16.mxu1 %v1630_v11  ;;  %v985_v11 = vld [vmem:[%s2361_s3 + $0xa0] sm:$0xff] }
  0x7b   : > { %1089 = vperm.xlu1 %1527, %v983_v10   ;;  %469 = vperm.xlu0 %1526, %v355_v12  }
  0x7f   : > { %1094 = vperm.xlu1 %1527, %v984_v13   ;;  %474 = vperm.xlu0 %1526, %v356_v14  }
  0x80   : > { %1455 = vmatmul.mubr.msk.bf16.gmra.mrb[28].mxu0 %vm652_vm1, %v1556_v15  ;;  %1463 = vmatmul.mubr.msk.bf16.gmra.mrb[28].mxu1 %vm652_vm1, %v1557_v16 }
  0x83   : > { %1099 = vperm.xlu1 %1527, %v985_v11   ;;  %479 = vperm.xlu0 %1526, %v357_v17  }
  0x87   : > { %1104 = vperm.xlu1 %1527, %v986_v18   ;;  %484 = vperm.xlu0 %1526, %v358_v19  }
  0x8b   : > { %1109 = vperm.xlu1 %1527, %v987_v20   ;;  %489 = vperm.xlu0 %1526, %v359_v21  }
  0x8f   : > { %1114 = vperm.xlu1 %1527, %v988_v22   ;;  %494 = vperm.xlu0 %1526, %v360_v23  }
  0x93   : > { %1119 = vperm.xlu1 %1527, %v989_v24   ;;  %499 = vperm.xlu0 %1526, %v361_v25  }
  0x97   : > { %1124 = vperm.xlu1 %1527, %v990_v26   ;;  %504 = vperm.xlu0 %1526, %v362_v27  }
  0x9b   : > { %1129 = vperm.xlu1 %1527, %v991_v28   ;;  %509 = vperm.xlu0 %1526, %v363_v29  }
  0x9f   : > { %1134 = vperm.xlu1 %1527, %v992_v30   ;;  %514 = vperm.xlu0 %1526, %v364_v31  }
  0xa3   : > { %1139 = vperm.xlu1 %1527, %v993_v32   ;;  %519 = vperm.xlu0 %1526, %v365_v33  }
  0xa7   : > { %1144 = vperm.xlu1 %1527, %v994_v34   ;;  %524 = vperm.xlu0 %1526, %v366_v35  }
  0xab   : > { %1154 = vperm.xlu1 %1527, %v996_v36   ;;  %1149 = vperm.xlu0 %1526, %v995_v37  }
  0xae   : > { %v2009_v38 = vpop.permute.xlu1 %379  ;;  %v370_v39 = vpop.permute.xlu0 %369 }
  0xb2   : > { %v2011_v40 = vpop.permute.xlu1 %384  ;;  %v375_v41 = vpop.permute.xlu0 %374 }
  0xb6   : > { %v2013_v42 = vpop.permute.xlu1 %394  ;;  %v2015_v43 = vpop.permute.xlu0 %389 }
  0xba   : > { %v2017_v44 = vpop.permute.xlu1 %404  ;;  %v2019_v45 = vpop.permute.xlu0 %399 }
  0xbe   : > { %v2021_v46 = vpop.permute.xlu1 %414  ;;  %v2023_v47 = vpop.permute.xlu0 %409 }
  0xc2   : > { %v2025_v48 = vpop.permute.xlu1 %424  ;;  %v2027_v49 = vpop.permute.xlu0 %419 }
  0xc6   : > { %v2029_v50 = vpop.permute.xlu1 %434  ;;  %v2031_v51 = vpop.permute.xlu0 %429 }
  0xca   : > { %v2033_v52 = vpop.permute.xlu1 %444  ;;  %v2035_v53 = vpop.permute.xlu0 %439 }
  0xce   : > { %v2037_v54 = vpop.permute.xlu1 %454  ;;  %v2039_v55 = vpop.permute.xlu0 %449 }
  0xd2   : > { %v2041_v56 = vpop.permute.xlu1 %464  ;;  %v2043_v57 = vpop.permute.xlu0 %459 }
  0xd6   : > { %v1005_v58 = vpop.permute.xlu1 %1004  ;;  %v1000_v59 = vpop.permute.xlu0 %999 }
  0xda   : > { %v2045_v60 = vpop.permute.xlu1 %1014  ;;  %v1010_v61 = vpop.permute.xlu0 %1009 }
  0xde   : > { %v2047_v62 = vpop.permute.xlu1 %1024  ;;  %v2049_v63 = vpop.permute.xlu0 %1019 }
  0xe2   : > { %v2051_v0 = vpop.permute.xlu1 %1034  ;;  %v2053_v1 = vpop.permute.xlu0 %1029 }
  0xe6   : > { %v2055_v2 = vpop.permute.xlu1 %1044  ;;  %v2057_v3 = vpop.permute.xlu0 %1039 }
  0xea   : > { %v2059_v4 = vpop.permute.xlu1 %1054  ;;  %v2061_v5 = vpop.permute.xlu0 %1049 }
  0xee   : > { %v2063_v6 = vpop.permute.xlu1 %1064  ;;  %v2065_v7 = vpop.permute.xlu0 %1059 }
  0xf2   : > { %v2067_v8 = vpop.permute.xlu1 %1074  ;;  %v2069_v9 = vpop.permute.xlu0 %1069 }
  0xf6   : > { %v2071_v10 = vpop.permute.xlu1 %1084  ;;  %v2073_v12 = vpop.permute.xlu0 %1079 }
  0xfa   : > { %v2083_v27 = vpop.permute.xlu1 %1089  ;;  %v2085_v28 = vpop.permute.xlu0 %469 }
 0x11b   : > { %v742_v13 = vpop.f32.mrb[0].mxu0  ;;  %v2075_v14 = vpop.f32.mrb[0].mxu1 }
 0x11c   : > { %v743_v15 = vadd.f32 %v742_v13, %v370_v39  ;;  %v744_v16 = vpop.f32.mrb[1].mxu0  ;;  %v2077_v11 = vpop.f32.mrb[1].mxu1 }
 0x11d   : > { %v745_v17 = vadd.f32 %v744_v16, %v370_v39  ;;  %v746_v18 = vpop.f32.mrb[2].mxu0  ;;  %v2079_v19 = vpop.f32.mrb[2].mxu1 }
 0x11e   : > { %v901_v20 = vmax.f32 %v743_v15, 0.0  ;;  %v747_v21 = vadd.f32 %v746_v18, %v375_v41  ;;  %v748_v22 = vpop.f32.mrb[3].mxu0  ;;  %v2081_v23 = vpop.f32.mrb[3].mxu1 }
 0x11f   : > { %v902_v25 = vmax.f32 %v745_v17, 0.0  ;;  %v749_v26 = vadd.f32 %v748_v22, %v375_v41 }
 0x120   : > { %v903_v24 = vmax.f32 %v747_v21, 0.0  ;;  %v1157_v29 = vmul.f32 %v1000_v59, %v901_v20 }
 0x121   : > { %v904_v31 = vmax.f32 %v749_v26, 0.0  ;;  %v1158_v39 = vmul.f32 %v1000_v59, %v902_v25  ;;  %v2099_v59 = vpop.permute.xlu1 %1094 }
 0x122   : > { %v1159_v30 = vmul.f32 %v1005_v58, %v903_v24  ;;  %2370 = vst [vmem:[#allocation7_spill] sm:$0xff] %v2099_v59 }
 0x123   : > { %v752_v32 = vpop.f32.mrb[4].mxu0  ;;  %v2087_v33 = vpop.f32.mrb[4].mxu1  ;;  %v1160_v13 = vmul.f32 %v1005_v58, %v904_v31 }
 0x124   : > { %v1221_v34 = vadd.f32 %v1159_v30, %v1157_v29  ;;  %v753_v35 = vadd.f32 %v752_v32, %v2009_v38  ;;  %v754_v36 = vpop.f32.mrb[5].mxu0  ;;  %v2090_v37 = vpop.f32.mrb[5].mxu1 }
 0x125   : > { %v755_v41 = vadd.f32 %v754_v36, %v2009_v38  ;;  %v756_v15 = vpop.f32.mrb[6].mxu0  ;;  %v2093_v16 = vpop.f32.mrb[6].mxu1  ;;  %v1258_v20 = vadd.f32 %v1160_v13, %v1158_v39 }
 0x126   : > { %v905_v17 = vmax.f32 %v753_v35, 0.0  ;;  %v757_v18 = vadd.f32 %v756_v15, %v2011_v40  ;;  %v758_v22 = vpop.f32.mrb[7].mxu0  ;;  %v2096_v24 = vpop.f32.mrb[7].mxu1 }
 0x127   : > { %v906_v21 = vmax.f32 %v755_v41, 0.0  ;;  %v759_v32 = vadd.f32 %v758_v22, %v2011_v40  ;;  %v2101_v58 = vpop.permute.xlu0 %474 }
 0x128   : > { %v1161_v26 = vmul.f32 %v1010_v61, %v905_v17  ;;  %v907_v29 = vmax.f32 %v757_v18, 0.0 }
 0x129   : > { %v1162_v30 = vmul.f32 %v1010_v61, %v906_v21  ;;  %v908_v35 = vmax.f32 %v759_v32, 0.0 }
 0x12a   : > { %v1222_v38 = vadd.f32 %v1221_v34, %v1161_v26  ;;  %v1163_v25 = vmul.f32 %v2045_v60, %v907_v29 }
 0x12b   : > { %v1259_v31 = vadd.f32 %v1258_v20, %v1162_v30  ;;  %v762_v36 = vpop.f32.mrb[8].mxu0  ;;  %v2104_v39 = vpop.f32.mrb[8].mxu1  ;;  %v1164_v40 = vmul.f32 %v2045_v60, %v908_v35 }
 0x12c   : > { %v1223_v13 = vadd.f32 %v1222_v38, %v1163_v25  ;;  %v763_v41 = vadd.f32 %v762_v36, %v2015_v43  ;;  %v764_v15 = vpop.f32.mrb[9].mxu0  ;;  %v2107_v17 = vpop.f32.mrb[9].mxu1 }
 0x12d   : > { %v765_v61 = vadd.f32 %v764_v15, %v2015_v43  ;;  %v766_v18 = vpop.f32.mrb[10].mxu0  ;;  %v2111_v21 = vpop.f32.mrb[10].mxu1  ;;  %v1260_v29 = vadd.f32 %v1259_v31, %v1164_v40 }
 0x12e   : > { %v909_v34 = vmax.f32 %v763_v41, 0.0  ;;  %v767_v20 = vadd.f32 %v766_v18, %v2013_v42  ;;  %v768_v22 = vpop.f32.mrb[11].mxu0  ;;  %v2114_v26 = vpop.f32.mrb[11].mxu1 }
 0x12f   : > { %v910_v30 = vmax.f32 %v765_v61, 0.0  ;;  %v769_v32 = vadd.f32 %v768_v22, %v2013_v42  ;;  %v2119_v43 = vpop.permute.xlu1 %1099  ;;  %v2121_v36 = vpop.permute.xlu0 %479 }
 0x130   : > { %v1165_v38 = vmul.f32 %v2049_v63, %v909_v34  ;;  %v911_v25 = vmax.f32 %v767_v20, 0.0  ;;  %2371 = vst [vmem:[#allocation8_spill] sm:$0xff] %v2119_v43 }
 0x131   : > { %v1166_v60 = vmul.f32 %v2049_v63, %v910_v30  ;;  %v912_v35 = vmax.f32 %v769_v32, 0.0 }
 0x132   : > { %v1224_v41 = vadd.f32 %v1223_v13, %v1165_v38  ;;  %v1167_v15 = vmul.f32 %v2047_v62, %v911_v25 }
 0x133   : > { %v1261_v18 = vadd.f32 %v1260_v29, %v1166_v60  ;;  %v1168_v59 = vmul.f32 %v2047_v62, %v912_v35  ;;  %v772_v31 = vpop.f32.mrb[12].mxu0  ;;  %v2125_v40 = vpop.f32.mrb[12].mxu1 }
 0x134   : > { %v1225_v42 = vadd.f32 %v1224_v41, %v1167_v15  ;;  %v773_v61 = vadd.f32 %v772_v31, %v2019_v45  ;;  %v774_v34 = vpop.f32.mrb[13].mxu0  ;;  %v2128_v20 = vpop.f32.mrb[13].mxu1 }
 0x135   : > { %v1262_v63 = vadd.f32 %v1261_v18, %v1168_v59  ;;  %v775_v22 = vadd.f32 %v774_v34, %v2019_v45  ;;  %v776_v30 = vpop.f32.mrb[14].mxu0  ;;  %v2131_v32 = vpop.f32.mrb[14].mxu1 }
 0x136   : > { %v913_v13 = vmax.f32 %v773_v61, 0.0  ;;  %v777_v29 = vadd.f32 %v776_v30, %v2017_v44  ;;  %v778_v38 = vpop.f32.mrb[15].mxu0  ;;  %v2134_v62 = vpop.f32.mrb[15].mxu1 }
 0x137   : > { %v914_v25 = vmax.f32 %v775_v22, 0.0  ;;  %v779_v60 = vadd.f32 %v778_v38, %v2017_v44  ;;  %v2139_v18 = vpop.permute.xlu1 %1104  ;;  %v2141_v45 = vpop.permute.xlu0 %484 }
 0x138   : > { %v1169_v35 = vmul.f32 %v2053_v1, %v913_v13  ;;  %v915_v41 = vmax.f32 %v777_v29, 0.0  ;;  %2372 = vst [vmem:[#allocation9_spill] sm:$0xff] %v2139_v18 }
 0x139   : > { %v1170_v15 = vmul.f32 %v2053_v1, %v914_v25  ;;  %v916_v59 = vmax.f32 %v779_v60, 0.0 }
 0x13a   : > { %v1226_v31 = vadd.f32 %v1225_v42, %v1169_v35  ;;  %v1171_v61 = vmul.f32 %v2051_v0, %v915_v41 }
 0x13b   : > { %v1263_v34 = vadd.f32 %v1262_v63, %v1170_v15  ;;  %v1172_v30 = vmul.f32 %v2051_v0, %v916_v59  ;;  %v782_v43 = vpop.f32.mrb[16].mxu0  ;;  %v2145_v22 = vpop.f32.mrb[16].mxu1 }
 0x13c   : > { %v1227_v44 = vadd.f32 %v1226_v31, %v1171_v61  ;;  %v783_v13 = vadd.f32 %v782_v43, %v2023_v47  ;;  %v784_v29 = vpop.f32.mrb[17].mxu0  ;;  %v2148_v38 = vpop.f32.mrb[17].mxu1 }
 0x13d   : > { %v1264_v1 = vadd.f32 %v1263_v34, %v1172_v30  ;;  %v785_v25 = vadd.f32 %v784_v29, %v2023_v47  ;;  %v786_v60 = vpop.f32.mrb[18].mxu0  ;;  %v2151_v18 = vpop.f32.mrb[18].mxu1 }
 0x13e   : > { %v917_v42 = vmax.f32 %v783_v13, 0.0  ;;  %v787_v63 = vadd.f32 %v786_v60, %v2021_v46  ;;  %v788_v35 = vpop.f32.mrb[19].mxu0  ;;  %v2154_v0 = vpop.f32.mrb[19].mxu1 }
 0x13f   : > { %2373 = vst [vmem:[#allocation10_spill] sm:$0xff] %v2154_v0  ;;  %v918_v41 = vmax.f32 %v785_v25, 0.0  ;;  %v789_v15 = vadd.f32 %v788_v35, %v2021_v46  ;;  %v2159_v34 = vpop.permute.xlu1 %1109  ;;  %v2161_v47 = vpop.permute.xlu0 %489 }
 0x140   : > { %v1173_v43 = vmul.f32 %v2057_v3, %v917_v42  ;;  %v919_v59 = vmax.f32 %v787_v63, 0.0  ;;  %2374 = vst [vmem:[#allocation11_spill] sm:$0xff] %v2159_v34 }
 0x141   : > { %v1174_v31 = vmul.f32 %v2057_v3, %v918_v41  ;;  %v920_v61 = vmax.f32 %v789_v15, 0.0 }
 0x142   : > { %v1228_v30 = vadd.f32 %v1227_v44, %v1173_v43  ;;  %v1175_v13 = vmul.f32 %v2055_v2, %v919_v59 }
 0x143   : > { %v1265_v29 = vadd.f32 %v1264_v1, %v1174_v31  ;;  %v1176_v60 = vmul.f32 %v2055_v2, %v920_v61  ;;  %v792_v0 = vpop.f32.mrb[20].mxu0  ;;  %v2165_v25 = vpop.f32.mrb[20].mxu1 }
 0x144   : > { %v1229_v46 = vadd.f32 %v1228_v30, %v1175_v13  ;;  %v793_v42 = vadd.f32 %v792_v0, %v2027_v49  ;;  %v794_v63 = vpop.f32.mrb[21].mxu0  ;;  %v2168_v35 = vpop.f32.mrb[21].mxu1 }
 0x145   : > { %v1266_v3 = vadd.f32 %v1265_v29, %v1176_v60  ;;  %v795_v41 = vadd.f32 %v794_v63, %v2027_v49  ;;  %v796_v15 = vpop.f32.mrb[22].mxu0  ;;  %v2171_v34 = vpop.f32.mrb[22].mxu1 }
 0x146   : > { %2375 = vst [vmem:[#allocation12_spill] sm:$0xff] %v2171_v34  ;;  %v921_v44 = vmax.f32 %v793_v42, 0.0  ;;  %v797_v1 = vadd.f32 %v796_v15, %v2025_v48  ;;  %v798_v43 = vpop.f32.mrb[23].mxu0  ;;  %v2174_v2 = vpop.f32.mrb[23].mxu1 }
 0x147   : > { %2376 = vst [vmem:[#allocation13_spill] sm:$0xff] %v2174_v2  ;;  %v922_v59 = vmax.f32 %v795_v41, 0.0  ;;  %v799_v31 = vadd.f32 %v798_v43, %v2025_v48  ;;  %v2179_v29 = vpop.permute.xlu1 %1114  ;;  %v2181_v49 = vpop.permute.xlu0 %494 }
 0x148   : > { %v1177_v0 = vmul.f32 %v2061_v5, %v921_v44  ;;  %v923_v61 = vmax.f32 %v797_v1, 0.0 }
 0x149   : > { %v1178_v30 = vmul.f32 %v2061_v5, %v922_v59  ;;  %v924_v13 = vmax.f32 %v799_v31, 0.0 }
 0x14a   : > { %v1230_v60 = vadd.f32 %v1229_v46, %v1177_v0  ;;  %v1179_v42 = vmul.f32 %v2059_v4, %v923_v61 }
 0x14b   : > { %v1267_v63 = vadd.f32 %v1266_v3, %v1178_v30  ;;  %v1180_v15 = vmul.f32 %v2059_v4, %v924_v13  ;;  %v802_v2 = vpop.f32.mrb[24].mxu0  ;;  %v2185_v41 = vpop.f32.mrb[24].mxu1 }
 0x14c   : > { %v1231_v48 = vadd.f32 %v1230_v60, %v1179_v42  ;;  %v803_v44 = vadd.f32 %v802_v2, %v2031_v51  ;;  %v804_v1 = vpop.f32.mrb[25].mxu0  ;;  %v2188_v43 = vpop.f32.mrb[25].mxu1 }
 0x14d   : > { %v1268_v5 = vadd.f32 %v1267_v63, %v1180_v15  ;;  %v805_v59 = vadd.f32 %v804_v1, %v2031_v51  ;;  %v806_v31 = vpop.f32.mrb[26].mxu0  ;;  %v2191_v34 = vpop.f32.mrb[26].mxu1 }
 0x14e   : > { %v925_v46 = vmax.f32 %v803_v44, 0.0  ;;  %v807_v3 = vadd.f32 %v806_v31, %v2029_v50  ;;  %v808_v0 = vpop.f32.mrb[27].mxu0  ;;  %v2194_v4 = vpop.f32.mrb[27].mxu1 }
 0x14f   : > { %2377 = vst [vmem:[#allocation14_spill] sm:$0xff] %v2194_v4  ;;  %v926_v61 = vmax.f32 %v805_v59, 0.0  ;;  %v809_v30 = vadd.f32 %v808_v0, %v2029_v50  ;;  %v2199_v63 = vpop.permute.xlu1 %1119  ;;  %v2201_v51 = vpop.permute.xlu0 %499  ;;  %v823_v50 = vadd.f32 %v2075_v14, %v2039_v55 }
 0x150   : > { %v1181_v2 = vmul.f32 %v2065_v7, %v925_v46  ;;  %v927_v13 = vmax.f32 %v807_v3, 0.0 }
 0x151   : > { %v1182_v60 = vmul.f32 %v2065_v7, %v926_v61  ;;  %v928_v42 = vmax.f32 %v809_v30, 0.0 }
 0x152   : > { %v1232_v15 = vadd.f32 %v1231_v48, %v1181_v2  ;;  %v1183_v44 = vmul.f32 %v2063_v6, %v927_v13  ;;  %v825_v48 = vadd.f32 %v2077_v11, %v2039_v55  ;;  %v827_v2 = vadd.f32 %v2079_v19, %v2037_v54 }
 0x153   : > { %v1269_v1 = vadd.f32 %v1268_v5, %v1182_v60  ;;  %v1184_v31 = vmul.f32 %v2063_v6, %v928_v42  ;;  %v812_v4 = vpop.f32.mrb[28].mxu0  ;;  %v2205_v59 = vpop.f32.mrb[28].mxu1  ;;  %v829_v42 = vadd.f32 %v2081_v23, %v2037_v54  ;;  %v933_v11 = vmax.f32 %v823_v50, 0.0 }
 0x154   : > { %v1233_v46 = vadd.f32 %v1232_v15, %v1183_v44  ;;  %v813_v7 = vadd.f32 %v812_v4, %v2035_v53  ;;  %v814_v3 = vpop.f32.mrb[29].mxu0  ;;  %v2210_v0 = vpop.f32.mrb[29].mxu1  ;;  %v935_v54 = vmax.f32 %v827_v2, 0.0 }
 0x155   : > { %v1270_v61 = vadd.f32 %v1269_v1, %v1184_v31  ;;  %v815_v5 = vadd.f32 %v814_v3, %v2035_v53  ;;  %v816_v30 = vpop.f32.mrb[30].mxu0  ;;  %v2215_v6 = vpop.f32.mrb[30].mxu1  ;;  %v833_v53 = vadd.f32 %v2087_v33, %v2043_v57  ;;  %v934_v31 = vmax.f32 %v825_v48, 0.0 }
 0x156   : > { %v929_v13 = vmax.f32 %v813_v7, 0.0  ;;  %v817_v14 = vadd.f32 %v816_v30, %v2033_v52  ;;  %v818_v60 = vpop.f32.mrb[31].mxu0  ;;  %v2220_v4 = vpop.f32.mrb[31].mxu1  ;;  %v835_v7 = vadd.f32 %v2090_v37, %v2043_v57  ;;  %v1189_v57 = vmul.f32 %v2073_v12, %v933_v11 }
 0x157   : > { %v930_v15 = vmax.f32 %v815_v5, 0.0  ;;  %v819_v55 = vadd.f32 %v818_v60, %v2033_v52  ;;  %v2228_v19 = vpop.permute.xlu0 %504  ;;  %v837_v52 = vadd.f32 %v2093_v16, %v2041_v56  ;;  %v2236_v33 = vpop.permute.xlu1 %1124  ;;  %v936_v5 = vmax.f32 %v829_v42, 0.0 }
 0x158   : > { %v1185_v44 = vmul.f32 %v2069_v9, %v929_v13  ;;  %v931_v1 = vmax.f32 %v817_v14, 0.0  ;;  %v839_v13 = vadd.f32 %v2096_v24, %v2041_v56  ;;  %v843_v37 = vadd.f32 %v2104_v39, %v2085_v28 }
 0x159   : > { %v1186_v3 = vmul.f32 %v2069_v9, %v930_v15  ;;  %v932_v30 = vmax.f32 %v819_v55, 0.0  ;;  %v937_v9 = vmax.f32 %v833_v53, 0.0  ;;  %v1190_v16 = vmul.f32 %v2073_v12, %v934_v31 }
 0x15a   : > { %v1234_v23 = vadd.f32 %v1233_v46, %v1185_v44  ;;  %v1187_v50 = vmul.f32 %v2067_v8, %v931_v1  ;;  %v938_v46 = vmax.f32 %v835_v7, 0.0  ;;  %v845_v60 = vadd.f32 %v2107_v17, %v2085_v28 }
 0x15b   : > { %v1271_v48 = vadd.f32 %v1270_v61, %v1186_v3  ;;  %v1188_v14 = vmul.f32 %v2067_v8, %v932_v30  ;;  %v1191_v15 = vmul.f32 %v2071_v10, %v935_v54  ;;  %v939_v56 = vmax.f32 %v837_v52, 0.0  ;;  %v2250_v61 = vpop.permute.xlu0 %509  ;;  %v2258_v1 = vpop.permute.xlu1 %1129  ;;  %v2378_v3 = vld [vmem:[#allocation7_spill] sm:$0xff] }
 0x15c   : > { %v1235_v2 = vadd.f32 %v1234_v23, %v1187_v50  ;;  %v847_v8 = vadd.f32 %v2111_v21, %v2101_v58  ;;  %v1192_v55 = vmul.f32 %v2071_v10, %v936_v5  ;;  %v940_v39 = vmax.f32 %v839_v13, 0.0 }
 0x15d   : > { %v1272_v42 = vadd.f32 %v1271_v48, %v1188_v14  ;;  %v849_v12 = vadd.f32 %v2114_v26, %v2101_v58  ;;  %v1193_v53 = vmul.f32 %v2083_v27, %v937_v9  ;;  %v941_v28 = vmax.f32 %v843_v37, 0.0  ;;  %v2380_v37 = vld [vmem:[#allocation9_spill] sm:$0xff] }
 0x15e   : > { %v1236_v24 = vadd.f32 %v1235_v2, %v1189_v57  ;;  %v853_v17 = vadd.f32 %v2125_v40, %v2121_v36  ;;  %v1194_v21 = vmul.f32 %v2083_v27, %v938_v46  ;;  %v942_v31 = vmax.f32 %v845_v60, 0.0  ;;  %v2379_v27 = vld [vmem:[#allocation8_spill] sm:$0xff] }
 0x15f   : > { %v1273_v11 = vadd.f32 %v1272_v42, %v1190_v16  ;;  %v855_v10 = vadd.f32 %v2128_v20, %v2121_v36  ;;  %v1195_v30 = vmul.f32 %v2378_v3, %v939_v56  ;;  %v943_v58 = vmax.f32 %v847_v8, 0.0  ;;  %v515_v48 = vpop.permute.xlu0 %514  ;;  %v1135_v46 = vpop.permute.xlu1 %1134  ;;  %v2381_v42 = vld [vmem:[#allocation10_spill] sm:$0xff]  ;;  %v2382_v8 = vld [vmem:[#allocation11_spill] sm:$0xff] }
 0x160   : > { %v1237_v44 = vadd.f32 %v1236_v24, %v1191_v15  ;;  %v857_v26 = vadd.f32 %v2131_v32, %v2141_v45  ;;  %v1196_v52 = vmul.f32 %v2378_v3, %v940_v39  ;;  %v944_v40 = vmax.f32 %v849_v12, 0.0 }
 0x161   : > { %v1274_v7 = vadd.f32 %v1273_v11, %v1192_v55  ;;  %v859_v23 = vadd.f32 %v2134_v62, %v2141_v45  ;;  %v1197_v5 = vmul.f32 %v2379_v27, %v941_v28  ;;  %v945_v13 = vmax.f32 %v853_v17, 0.0 }
 0x162   : > { %v1238_v54 = vadd.f32 %v1237_v44, %v1193_v53  ;;  %v863_v36 = vadd.f32 %v2145_v22, %v2161_v47  ;;  %v1198_v14 = vmul.f32 %v2379_v27, %v942_v31  ;;  %v946_v57 = vmax.f32 %v855_v10, 0.0 }
 0x163   : > { %v1275_v50 = vadd.f32 %v1274_v7, %v1194_v21  ;;  %v865_v32 = vadd.f32 %v2148_v38, %v2161_v47  ;;  %v1199_v2 = vmul.f32 %v2380_v37, %v943_v58  ;;  %v947_v16 = vmax.f32 %v857_v26, 0.0  ;;  %v520_v21 = vpop.permute.xlu0 %519  ;;  %v1140_v26 = vpop.permute.xlu1 %1139 }
 0x164   : > { %v1239_v20 = vadd.f32 %v1238_v54, %v1195_v30  ;;  %v867_v62 = vadd.f32 %v2151_v18, %v2181_v49  ;;  %v1200_v60 = vmul.f32 %v2380_v37, %v944_v40  ;;  %v948_v22 = vmax.f32 %v859_v23, 0.0 }
 0x165   : > { %v1276_v9 = vadd.f32 %v1275_v50, %v1196_v52  ;;  %v869_v15 = vadd.f32 %v2381_v42, %v2181_v49  ;;  %v1201_v24 = vmul.f32 %v2382_v8, %v945_v13  ;;  %v949_v55 = vmax.f32 %v863_v36, 0.0  ;;  %v2383_v49 = vld [vmem:[#allocation12_spill] sm:$0xff]  ;;  %v2385_v36 = vld [vmem:[#allocation14_spill] sm:$0xff] }
 0x166   : > { %v1240_v45 = vadd.f32 %v1239_v20, %v1197_v5  ;;  %v873_v38 = vadd.f32 %v2165_v25, %v2201_v51  ;;  %v1202_v39 = vmul.f32 %v2382_v8, %v946_v57  ;;  %v950_v12 = vmax.f32 %v865_v32, 0.0  ;;  %v2384_v25 = vld [vmem:[#allocation13_spill] sm:$0xff] }
 0x167   : > { %v1277_v56 = vadd.f32 %v1276_v9, %v1198_v14  ;;  %v875_v18 = vadd.f32 %v2168_v35, %v2201_v51  ;;  %v1203_v53 = vmul.f32 %v2179_v29, %v947_v16  ;;  %v951_v28 = vmax.f32 %v867_v62, 0.0 }
 0x168   : > { %v1241_v47 = vadd.f32 %v1240_v45, %v1199_v2  ;;  %v877_v17 = vadd.f32 %v2383_v49, %v2228_v19  ;;  %v1204_v31 = vmul.f32 %v2179_v29, %v948_v22  ;;  %v952_v10 = vmax.f32 %v869_v15, 0.0 }
 0x169   : > { %v1278_v11 = vadd.f32 %v1277_v56, %v1200_v60  ;;  %v879_v7 = vadd.f32 %v2384_v25, %v2228_v19  ;;  %v1205_v30 = vmul.f32 %v2199_v63, %v949_v55  ;;  %v953_v58 = vmax.f32 %v873_v38, 0.0 }
 0x16a   : > { %v1242_v44 = vadd.f32 %v1241_v47, %v1201_v24  ;;  %v883_v35 = vadd.f32 %v2185_v41, %v2250_v61  ;;  %v1206_v54 = vmul.f32 %v2199_v63, %v950_v12  ;;  %v954_v52 = vmax.f32 %v875_v18, 0.0 }
 0x16b   : > { %v1279_v3 = vadd.f32 %v1278_v11, %v1202_v39  ;;  %v885_v40 = vadd.f32 %v2188_v43, %v2250_v61  ;;  %v1207_v23 = vmul.f32 %v2236_v33, %v951_v28  ;;  %v955_v50 = vmax.f32 %v877_v17, 0.0  ;;  %v525_v43 = vpop.permute.xlu0 %524 }
 0x16c   : > { %v1243_v51 = vadd.f32 %v1242_v44, %v1203_v53  ;;  %v887_v19 = vadd.f32 %v2191_v34, %v515_v48  ;;  %v1208_v5 = vmul.f32 %v2236_v33, %v952_v10  ;;  %v956_v13 = vmax.f32 %v879_v7, 0.0 }
 0x16d   : > { %v1280_v29 = vadd.f32 %v1279_v3, %v1204_v31  ;;  %v889_v41 = vadd.f32 %v2385_v36, %v515_v48  ;;  %v1209_v14 = vmul.f32 %v2258_v1, %v953_v58  ;;  %v957_v63 = vmax.f32 %v883_v35, 0.0  ;;  %v1145_v48 = vpop.permute.xlu1 %1144 }
 0x16e   : > { %v1244_v27 = vadd.f32 %v1243_v51, %v1205_v30  ;;  %v893_v57 = vadd.f32 %v2205_v59, %v520_v21  ;;  %v1210_v61 = vmul.f32 %v2258_v1, %v954_v52  ;;  %v958_v9 = vmax.f32 %v885_v40, 0.0 }
 0x16f   : > { %v1281_v20 = vadd.f32 %v1280_v29, %v1206_v54  ;;  %v895_v37 = vadd.f32 %v2210_v0, %v520_v21  ;;  %v1211_v2 = vmul.f32 %v1135_v46, %v955_v50  ;;  %v959_v16 = vmax.f32 %v887_v19, 0.0  ;;  %v1150_v47 = vpop.permute.xlu0 %1149 }
 0x170   : > { %v1245_v32 = vadd.f32 %v1244_v27, %v1207_v23  ;;  %v897_v33 = vadd.f32 %v2215_v6, %v525_v43  ;;  %v1212_v45 = vmul.f32 %v1135_v46, %v956_v13  ;;  %v960_v60 = vmax.f32 %v889_v41, 0.0 }
 0x171   : > { %v1282_v34 = vadd.f32 %v1281_v20, %v1208_v5  ;;  %v899_v22 = vadd.f32 %v2220_v4, %v525_v43  ;;  %v1213_v59 = vmul.f32 %v1140_v26, %v957_v63  ;;  %v961_v15 = vmax.f32 %v893_v57, 0.0  ;;  %v1155_v46 = vpop.permute.xlu1 %1154 }
 0x172   : > { %v1246_v62 = vadd.f32 %v1245_v32, %v1209_v14  ;;  %v1214_v8 = vmul.f32 %v1140_v26, %v958_v9  ;;  %v962_v1 = vmax.f32 %v895_v37, 0.0  ;;  %v1215_v55 = vmul.f32 %v1145_v48, %v959_v16 }
 0x173   : > { %v1283_v42 = vadd.f32 %v1282_v34, %v1210_v61  ;;  %v963_v0 = vmax.f32 %v897_v33, 0.0  ;;  %v1216_v39 = vmul.f32 %v1145_v48, %v960_v60  ;;  %v964_v12 = vmax.f32 %v899_v22, 0.0 }
 0x174   : > { %v1247_v56 = vadd.f32 %v1246_v62, %v1211_v2  ;;  %v1217_v18 = vmul.f32 %v1150_v47, %v961_v15  ;;  %v1218_v53 = vmul.f32 %v1150_v47, %v962_v1  ;;  %v1296_v54 = vstv %s1295_s15 }
 0x175   : > { %v1284_v24 = vadd.f32 %v1283_v42, %v1212_v45  ;;  %v1219_v4 = vmul.f32 %v1155_v46, %v963_v0  ;;  %v1220_v17 = vmul.f32 %v1155_v46, %v964_v12  ;;  %v1631_v20 = vmov 1966171168  }
 0x176   : > { %v1248_v38 = vadd.f32 %v1247_v56, %v1213_v59  ;;  %v1315_v14 = vunpack.c.l.s4 %v1631_v20  ;;  %v1317_v63 = vlaneseq }
 0x177   : > { %v1285_v6 = vadd.f32 %v1284_v24, %v1214_v8 }
 0x178   : > { %v1249_v11 = vadd.f32 %v1248_v38, %v1215_v55  ;;  %v1316_v57 = vunpack.c.0.s8 %v1315_v14  ;;  %v1318_v32 = vshrl.u32 %v1317_v63, 7  ;;  %vm1331_vm2 = vcmp.lt.s32.totalorder %v1317_v63, 256 }
 0x179   : > { %v1286_v28 = vadd.f32 %v1285_v6, %v1216_v39 }
 0x17a   : > { %v1250_v49 = vadd.f32 %v1249_v11, %v1217_v18  ;;  %v1319_v61 = vsub.s32 %v1316_v57, %v1318_v32 }
 0x17b   : > { %v1287_v44 = vadd.f32 %v1286_v28, %v1218_v53 }
 0x17c   : > { %v1251_v21 = vadd.f32 %v1250_v49, %v1219_v4 }
 0x17d   : > { %v1288_v31 = vadd.f32 %v1287_v44, %v1220_v17 }
 0x17e   : > { %v1252_v10 = vrot.slane %v1251_v21, 4 }
 0x17f   : > { %v1289_v25 = vrot.slane %v1288_v31, 4 }
 0x180   : > { %v1253_v7 = vadd.f32 %v1252_v10, %v1251_v21 }
 0x181   : > { %v1290_v3 = vadd.f32 %v1289_v25, %v1288_v31 }
 0x182   : > { %v1254_v30 = vrot.slane %v1253_v7, 2 }
 0x183   : > { %v1291_v58 = vrot.slane %v1290_v3, 2 }
 0x184   : > { %v1255_v35 = vadd.f32 %v1254_v30, %v1253_v7 }
 0x185   : > { %v1292_v51 = vadd.f32 %v1291_v58, %v1290_v3 }
 0x186   : > { %v1256_v26 = vrot.slane %v1255_v35, 1 }
 0x187   : > { %v1293_v52 = vrot.slane %v1292_v51, 1 }
 0x188   : > { %v1257_v40 = vadd.f32 %v1256_v26, %v1255_v35 }
 0x189   : > { %v1294_v29 = vadd.f32 %v1293_v52, %v1292_v51 }
 0x18a   : > { %v1297_v23 = vadd.f32 %v1296_v54, %v1257_v40 }
 0x18b   : > { %v1298_v50 = vadd.f32 %v1296_v54, %v1294_v29 }
 0x18c   : > { %v1464_v19 = vmul.f32 -1.442695, %v1297_v23 }
 0x18d   : > { %v1465_v27 = vmul.f32 -1.442695, %v1298_v50 }
 0x18e   : > { %1558 = vpow2.f32 %v1464_v19 }
 0x18f   : > { %1560 = vpow2.f32 %v1465_v27 }
 0x198   : > { %v1559_v5 = vpop.eup %1558 }
 0x199   : > { %v1561_v13 = vpop.eup %1560  ;;  %v1305_v36 = vadd.f32 1.0, %v1559_v5 }
 0x19a   : > { %v1306_v41 = vadd.f32 1.0, %v1561_v13 }
 0x19b   : > { %1562 = vrcp.f32 %v1305_v36 }
 0x19c   : > { %1564 = vrcp.f32 %v1306_v41 }
 0x1a5   : > { %v1563_v43 = vpop.eup %1562 }
 0x1a6   : > { %v1565_v9 = vpop.eup %1564 }
 0x1a7   : > { %v1313_v37 = vcombine.low %v1563_v43, %v1565_v9 }
 0x1a9   : > { %v1320_v34 = vrot.slane %v1313_v37, %v1319_v61 }
 0x1ab   : > { %v1327_v2 = vrot.slane %v1320_v34, %v1319_v61 }
 0x1ad   : > { %1333 = vst.msk [vmem:[%s290_s19] sm:$0x3] %vm1331_vm2, %v1327_v2 }
 0x1ae   : > { %1579 = shalt.err (!%p1576_p5)
}
 0x1af   : > { %s1580_s17 = scalar_lea.hbm %s2315_s7, 32  ;;  %s1584_s13 = scalar_lea.hbm %s2363_s5, 128 }
 0x1b0   : > { %p1581_p7 = scmp.ne.s32.totalorder %s2315_s7, %s1580_s17  ;;  %p1585_p11 = scmp.lt.u32.totalorder %s2315_s7, %s2363_s5 }
 0x1b1   : > { %p1586_p12 = scmp.lt.u32.totalorder %s1584_s13, %s1580_s17  ;;  %p1588_p0 = scmp.lt.u32.totalorder %s1580_s17, %s2315_s7 }
 0x1b2   : > { %p1582_p9 = pnand %p1581_p7, %p1704_p6 }
 0x1b3   : > { %p1587_p13 = por %p1586_p12, %p1585_p11 }
 0x1b4   : > { %p1583_p10 = pneg %p1582_p9 }
 0x1b5   : > { %p1589_p1 = por %p1588_p0, %p1587_p13 }
 0x1b7   : > { %p1590_p2 = pnand %p1589_p1, %p1583_p10 }
 0x1b9   : > { %1593 = shalt.err (!%p1590_p2)
}
 0x1ba   : > { %1485 = dma.vmem_to_hbm [thread:$0]  (%p1704_p6), %s2317_s24, 32, %s2315_s7, %s1335_s6  }
 0x1bb PF: > { %p1491_p3 = scmp.ge.s32.totalorder %s1628_s23, 2  ;;  %s1361_s16 = sand.u32 1, %s1616_s20  }
 0x1bc   : > { %s1362_s18 = scalar_lea.sflag [#allocation5], %s1361_s16 }
 0x1bd   : > { %p1488_p4 = pnand %p1491_p3, %p1708_p8 }
 0x1bf   : > { %1611 = dma.done.wait (!%p1488_p4), %s1362_s18, 32  }
 0x1c0   : > { %1613 = vsyncadd (!%p1488_p4), %s1362_s18, 4294967264  ;;  %p16_p5 = scmp.ge.s32.totalorder %s1689_s25, 6   ;;  %s2386_s20 = smov %s1620_s21 }
 0x1c1   : > { %s2387_s21 = smov %s1624_s22  ;;  %s2388_s22 = smov %s1702_s28 }
 0x1c2   : > { %s2389_s23 = smov %s1689_s25  ;;  %18 = sbr.rel (!%p16_p5) target bundleno = 5 (0x5), region = 118 }
 0x1c9   :  { %1367 = vsyncpa [#allocation5], 1 }
 0x1ca   :  { %1369 = vsyncpa [#allocation5 + $0x1], 1 }

</bundles_post_ra>
